<compile_context>
chip_gen: v6e
topology: v6e:2x2x1
jax: 0.10.0
libtpu: 0.0.40
codegen_flags: <defaults>
</compile_context>

<pallas_src>
import functools

import jax
import jax.numpy as jnp
from jax.experimental import pallas as pl
from jax.experimental.pallas import tpu as pltpu

_LANE = 128
_SUBLANE = 8
_NEG = -1e30  # padding bias for padded vocab columns (finite -> exp underflows to 0)


def _round_up(x, m):
    return ((x + m - 1) // m) * m


def _pick_tile_v(vp, max_tile):
    """Largest lane-multiple vocab tile <= max_tile that divides Vp."""
    if vp <= max_tile:
        return vp
    t = (max_tile // _LANE) * _LANE
    while t >= _LANE:
        if vp % t == 0:
            return t
        t -= _LANE
    return _LANE


# ---------------------------------------------------------------------------
# Kernel: whole decode sequence, grid over vocab tiles of the output proj.
# ---------------------------------------------------------------------------
def _decoder_kernel(x_ref, h0_ref, wgx_ref, wgh_ref, bg_ref, wout_ref, bout_ref,
                    logits_ref, lse_ref, hfin_ref,
                    hall_scr, m_scr, l_scr, *, gs, bp, n_steps):
    j = pl.program_id(0)

    # --- GRU recurrence over all decode steps: runs once, on the first vocab
    #     tile.  Gate weights are VMEM-resident for the whole grid; per-step
    #     hidden (bf16) is cached in scratch for the output projection.
    @pl.when(j == 0)
    def _():
        def gru_step(t, h):
            row = pl.multiple_of(t * bp, _SUBLANE)
            xt = x_ref[pl.ds(row, bp), :]                                # (Bp, Ep) f32
            g = (jnp.dot(xt, wgx_ref[...], preferred_element_type=jnp.float32)
                 + jnp.dot(h, wgh_ref[...], preferred_element_type=jnp.float32)
                 + bg_ref[...])                                          # (Bp, Wg) f32
            r = jax.nn.sigmoid(g[:, 0:gs])
            z = jax.nn.sigmoid(g[:, gs:2 * gs])
            n = jnp.tanh(g[:, 2 * gs:3 * gs] + r * g[:, 3 * gs:4 * gs])
            h_new = (1.0 - z) * n + z * h                                # (Bp, Hp) f32
            hall_scr[pl.ds(row, bp), :] = h_new.astype(jnp.bfloat16)
            return h_new

        h_last = jax.lax.fori_loop(0, n_steps, gru_step, h0_ref[...],
                                   unroll=(n_steps <= 8))
        hfin_ref[...] = h_last
        m_scr[...] = jnp.full_like(m_scr, _NEG)
        l_scr[...] = jnp.zeros_like(l_scr)

    # --- output projection for this vocab tile, all decode steps at once.
    logits = (jnp.dot(hall_scr[...], wout_ref[...],
                      preferred_element_type=jnp.float32)
              + bout_ref[...])                                           # (T*Bp, tv) f32
    logits_ref[...] = logits                                             # per-tile writeback

    # --- online log-sum-exp stats (lane-replicated across 128 lanes).
    m_prev = m_scr[...]
    m_new = jnp.maximum(m_prev, jnp.max(logits, axis=-1, keepdims=True))
    l_scr[...] = (l_scr[...] * jnp.exp(m_prev - m_new)
                  + jnp.sum(jnp.exp(logits - m_new[:, :1]), axis=-1, keepdims=True))
    m_scr[...] = m_new

    @pl.when(j == pl.num_programs(0) - 1)
    def _():
        lse_ref[...] = m_scr[...] + jnp.log(l_scr[...])


# ---------------------------------------------------------------------------
# One-time parameter packing (transpose / fuse / pad / cast).  Not per-call.
# ---------------------------------------------------------------------------
def pack_params(raw, *, max_tile_v=2048):
    V, E = raw["embedding"].shape
    H = raw["w_hh"].shape[1]
    Ep = _round_up(E, 16)                 # K dims: sublane padding only
    Hp = _round_up(H, 16)
    Wg = _round_up(4 * Hp, _LANE)         # tightly packed gate columns
    Vp = _round_up(V, _LANE)
    tv = _pick_tile_v(Vp, max_tile_v)

    w_ih, w_hh = raw["w_ih"], raw["w_hh"]          # (3H, E), (3H, H) torch layout
    b_ih, b_hh = raw["b_ih"], raw["b_hh"]

    # Gate columns [r | z | n_x | n_h] at stride Hp; x- and h-side kept as two
    # small matrices so no in-kernel concat is needed.  r/z biases pre-summed.
    wgx = jnp.zeros((Ep, Wg), jnp.float32)
    wgh = jnp.zeros((Hp, Wg), jnp.float32)
    bg = jnp.zeros((1, Wg), jnp.float32)
    for k in range(2):                              # r, z
        wgx = wgx.at[:E, k * Hp:k * Hp + H].set(w_ih[k * H:(k + 1) * H].T)
        wgh = wgh.at[:H, k * Hp:k * Hp + H].set(w_hh[k * H:(k + 1) * H].T)
        bg = bg.at[0, k * Hp:k * Hp + H].set(b_ih[k * H:(k + 1) * H]
                                             + b_hh[k * H:(k + 1) * H])
    wgx = wgx.at[:E, 2 * Hp:2 * Hp + H].set(w_ih[2 * H:3 * H].T)   # n_x
    bg = bg.at[0, 2 * Hp:2 * Hp + H].set(b_ih[2 * H:3 * H])
    wgh = wgh.at[:H, 3 * Hp:3 * Hp + H].set(w_hh[2 * H:3 * H].T)   # n_h
    bg = bg.at[0, 3 * Hp:3 * Hp + H].set(b_hh[2 * H:3 * H])

    wout = jnp.zeros((Hp, Vp), jnp.float32).at[:H, :V].set(raw["w_out"].T)
    bout = jnp.full((1, Vp), _NEG, jnp.float32).at[0, :V].set(raw["b_out"])
    emb = jnp.zeros((V, Ep), jnp.float32).at[:, :E].set(raw["embedding"])

    return {
        "embedding": emb,                            # (V, Ep) f32
        "w_gx": wgx,                                 # (Ep, Wg) f32 (tiny, kept f32)
        "w_gh": wgh,                                 # (Hp, Wg) f32
        "b_g": bg,                                   # (1, Wg) f32
        "w_out_t": wout.astype(jnp.bfloat16),        # (Hp, Vp) bf16 (dominant DMA)
        "b_out": bout,                               # (1, Vp) f32
        "dims": (E, H, V, Ep, Hp, Vp, Wg, tv),
    }


# ---------------------------------------------------------------------------
# Forward: tokens (B, T).  T == 1 matches DecoderRNN.forward(input, hidden, _).
# ---------------------------------------------------------------------------
def decoder_rnn_forward(tokens, hidden, packed, *, dropout_rate=0.1, rng_key=None):
    """tokens: (B, T) int32; hidden: (1, B, H) f32.
    Returns (log_probs (B, V) if T==1 else (T, B, V), new_hidden (1, B, H))."""
    E, H, V, Ep, Hp, Vp, Wg, tv = packed["dims"]
    B, T = tokens.shape
    Bp = _round_up(max(B, _SUBLANE), _SUBLANE)

    # embedding(input).transpose(0, 1)  -> (T, B, Ep)
    x = packed["embedding"][tokens]                      # (B, T, Ep) f32
    # F.dropout (training=True default) -- keep-mask drawn with host-side RNG.
    if dropout_rate > 0.0 and rng_key is not None:
        keep = jax.random.bernoulli(rng_key, 1.0 - dropout_rate, x.shape)
        x = jnp.where(keep, x * (1.0 / (1.0 - dropout_rate)), 0.0)
    x = jnp.transpose(x, (1, 0, 2))                      # (T, B, Ep)
    x_p = jnp.zeros((T, Bp, Ep), jnp.float32).at[:, :B, :].set(x)
    x_p = x_p.reshape(T * Bp, Ep)

    h0 = jnp.zeros((Bp, Hp), jnp.float32).at[:B, :H].set(hidden[0])

    n_tiles = Vp // tv
    rows = T * Bp
    kernel = functools.partial(_decoder_kernel, gs=Hp, bp=Bp, n_steps=T)

    logits, lse, h_fin = pl.pallas_call(
        kernel,
        out_shape=(jax.ShapeDtypeStruct((rows, Vp), jnp.float32),   # raw logits
                   jax.ShapeDtypeStruct((rows, _LANE), jnp.float32),  # lse (lane-padded)
                   jax.ShapeDtypeStruct((Bp, Hp), jnp.float32)),    # final hidden
        grid=(n_tiles,),
        in_specs=[
            pl.BlockSpec((rows, Ep), lambda j: (0, 0)),       # embedded+dropout x (resident)
            pl.BlockSpec((Bp, Hp), lambda j: (0, 0)),         # initial hidden (resident)
            pl.BlockSpec((Ep, Wg), lambda j: (0, 0)),         # gate W (x side), resident
            pl.BlockSpec((Hp, Wg), lambda j: (0, 0)),         # gate W (h side), resident
            pl.BlockSpec((1, Wg), lambda j: (0, 0)),          # gate bias, resident
            pl.BlockSpec((Hp, tv), lambda j: (0, j)),         # W_out^T tile (pipelined)
            pl.BlockSpec((1, tv), lambda j: (0, j)),          # b_out tile
        ],
        out_specs=(
            pl.BlockSpec((rows, tv), lambda j: (0, j)),       # per-tile logits writeback
            pl.BlockSpec((rows, _LANE), lambda j: (0, 0)),    # lse (resident)
            pl.BlockSpec((Bp, Hp), lambda j: (0, 0)),         # final hidden (resident)
        ),
        scratch_shapes=[
            pltpu.VMEM((rows, Hp), jnp.bfloat16),             # hidden history (bf16 for MXU)
            pltpu.VMEM((rows, _LANE), jnp.float32),           # running max
            pltpu.VMEM((rows, _LANE), jnp.float32),           # running sum(exp)
        ],
        compiler_params=pltpu.CompilerParams(
            dimension_semantics=("arbitrary",)),              # vocab axis is sequential
    )(x_p, h0, packed["w_gx"], packed["w_gh"], packed["b_g"],
      packed["w_out_t"], packed["b_out"])

    logits = logits.reshape(T, Bp, Vp)
    lse = lse.reshape(T, Bp, _LANE)
    logp = logits[:, :B, :V] - lse[:, :B, :1]
    h_new = h_fin[:B, :H][None, :, :]
    if T == 1:
        return logp[0], h_new
    return logp, h_new


# ---------------------------------------------------------------------------
# Raw (torch-layout) params + pure-JAX reference for verification.
# ---------------------------------------------------------------------------
def init_params(key, *, embedding_size, hidden_size, output_size, padding_idx=3):
    E, H, V = embedding_size, hidden_size, output_size
    ks = jax.random.split(key, 7)
    k = 1.0 / jnp.sqrt(jnp.float32(H))
    emb = jax.random.normal(ks[0], (V, E), dtype=jnp.float32) * 0.1
    emb = emb.at[padding_idx].set(0.0)               # nn.Embedding padding_idx row
    return {
        "embedding": emb,
        "w_ih": jax.random.uniform(ks[1], (3 * H, E), jnp.float32, -k, k),
        "w_hh": jax.random.uniform(ks[2], (3 * H, H), jnp.float32, -k, k),
        "b_ih": jax.random.uniform(ks[3], (3 * H,), jnp.float32, -k, k),
        "b_hh": jax.random.uniform(ks[4], (3 * H,), jnp.float32, -k, k),
        "w_out": jax.random.uniform(ks[5], (V, H), jnp.float32, -k, k),
        "b_out": jax.random.uniform(ks[6], (V,), jnp.float32, -k, k),
    }


def reference_forward(tokens, hidden, raw):
    """f32 step-wise reference, dropout disabled (torch GRU gate order r, z, n)."""
    H = raw["w_hh"].shape[1]
    B, T = tokens.shape
    h = hidden[0]
    outs = []
    for t in range(T):
        x = raw["embedding"][tokens[:, t]]
        gi = x @ raw["w_ih"].T + raw["b_ih"]
        gh = h @ raw["w_hh"].T + raw["b_hh"]
        r = jax.nn.sigmoid(gi[:, :H] + gh[:, :H])
        z = jax.nn.sigmoid(gi[:, H:2 * H] + gh[:, H:2 * H])
        n = jnp.tanh(gi[:, 2 * H:] + r * gh[:, 2 * H:])
        h = (1.0 - z) * n + z * h
        logits = h @ raw["w_out"].T + raw["b_out"]
        outs.append(jax.nn.log_softmax(logits, axis=1))
    return jnp.stack(outs, 0), h[None]


if __name__ == "__main__":
    B, E, H, V = 2, 32, 32, 200       # batch, embedding_size, hidden_size, output_size
    key = jax.random.PRNGKey(0)
    kp, kt, kh, kd, ks = jax.random.split(key, 5)

    raw = init_params(kp, embedding_size=E, hidden_size=H, output_size=V)
    packed = pack_params(raw)
    tokens = jax.random.randint(kt, (B, 1), 0, V, dtype=jnp.int32)   # decoder input (B, 1)
    hidden = jax.random.normal(kh, (1, B, H), dtype=jnp.float32)     # GRU hidden (1, B, H)

    # --- single-step (matches DecoderRNN.forward), dropout off, vs f32 reference ---
    logp, h_new = decoder_rnn_forward(tokens, hidden, packed, dropout_rate=0.0)
    jax.block_until_ready((logp, h_new))
    logp_ref, h_ref = reference_forward(tokens, hidden, raw)

    assert logp.shape == (B, V) and h_new.shape == (1, B, H)
    assert bool(jnp.all(jnp.abs(h_new - h_ref) < 2e-2)), "hidden mismatch"
    assert bool(jnp.all(jnp.abs(logp - logp_ref[0]) < 3e-2)), "log_softmax mismatch"
    assert bool(jnp.all(jnp.abs(jnp.sum(jnp.exp(logp), axis=1) - 1.0) < 1e-3))

    # --- multi-step teacher-forced decode (weights stay VMEM-resident across T) ---
    T = 4
    tokens_seq = jax.random.randint(ks, (B, T), 0, V, dtype=jnp.int32)
    logp_seq, h_seq = decoder_rnn_forward(tokens_seq, hidden, packed, dropout_rate=0.0)
    jax.block_until_ready((logp_seq, h_seq))
    logp_seq_ref, h_seq_ref = reference_forward(tokens_seq, hidden, raw)
    assert logp_seq.shape == (T, B, V) and h_seq.shape == (1, B, H)
    assert bool(jnp.all(jnp.abs(h_seq - h_seq_ref) < 2e-2)), "seq hidden mismatch"
    assert bool(jnp.all(jnp.abs(logp_seq - logp_seq_ref) < 3e-2)), "seq logp mismatch"

    # --- training-mode path (dropout on): shape / normalization sanity only ---
    logp_d, h_new_d = decoder_rnn_forward(tokens, hidden, packed,
                                          dropout_rate=0.1, rng_key=kd)
    jax.block_until_ready((logp_d, h_new_d))
    assert logp_d.shape == (B, V) and h_new_d.shape == (1, B, H)
    assert bool(jnp.all(jnp.abs(jnp.sum(jnp.exp(logp_d), axis=1) - 1.0) < 1e-3))

    print("KERNEL_OK")
</pallas_src>

<mosaic_0001>
module attributes {stable_mosaic.version = 11 : i64} {
  func.func @_decoder_kernel(%arg0: i32, %arg1: memref<8x32xf32, #tpu.memory_space<vmem>>, %arg2: memref<8x32xf32, #tpu.memory_space<vmem>>, %arg3: memref<32x128xf32, #tpu.memory_space<vmem>>, %arg4: memref<32x128xf32, #tpu.memory_space<vmem>>, %arg5: memref<1x128xf32, #tpu.memory_space<vmem>>, %arg6: memref<32x256xbf16, #tpu.memory_space<vmem>>, %arg7: memref<1x256xf32, #tpu.memory_space<vmem>>, %arg8: memref<8x256xf32, #tpu.memory_space<vmem>>, %arg9: memref<8x128xf32, #tpu.memory_space<vmem>>, %arg10: memref<8x32xf32, #tpu.memory_space<vmem>>, %arg11: memref<8x32xbf16, #tpu.memory_space<vmem>>, %arg12: memref<8x128xf32, #tpu.memory_space<vmem>>, %arg13: memref<8x128xf32, #tpu.memory_space<vmem>>) attributes {dimension_semantics = [#tpu.dimension_semantics<arbitrary>], iteration_bounds = array<i64: 1>, scalar_prefetch = 0 : i64, scratch_operands = 3 : i64, tpu.core_type = #tpu.core_type<tc>, window_params = [{pipeline_mode = #tpu.pipeline_mode<synchronous>, transform_indices = @transform_0, window_bounds = array<i64: 8, 32>}, {pipeline_mode = #tpu.pipeline_mode<synchronous>, transform_indices = @transform_1, window_bounds = array<i64: 8, 32>}, {pipeline_mode = #tpu.pipeline_mode<synchronous>, transform_indices = @transform_2, window_bounds = array<i64: 32, 128>}, {pipeline_mode = #tpu.pipeline_mode<synchronous>, transform_indices = @transform_3, window_bounds = array<i64: 32, 128>}, {pipeline_mode = #tpu.pipeline_mode<synchronous>, transform_indices = @transform_4, window_bounds = array<i64: 1, 128>}, {transform_indices = @transform_5, window_bounds = array<i64: 32, 256>}, {transform_indices = @transform_6, window_bounds = array<i64: 1, 256>}, {transform_indices = @transform_7, window_bounds = array<i64: 8, 256>}, {pipeline_mode = #tpu.pipeline_mode<synchronous>, transform_indices = @transform_8, window_bounds = array<i64: 8, 128>}, {pipeline_mode = #tpu.pipeline_mode<synchronous>, transform_indices = @transform_9, window_bounds = array<i64: 8, 32>}]} {
    %c0_i32 = arith.constant 0 : i32
    %0 = arith.cmpi eq, %arg0, %c0_i32 : i32
    %1 = arith.extui %0 : i1 to i32
    %c0_i32_0 = arith.constant 0 : i32
    %2 = arith.cmpi ne, %1, %c0_i32_0 : i32
    scf.if %2 {
      %c0_20 = arith.constant 0 : index
      %c0_21 = arith.constant 0 : index
      %32 = vector.load %arg2[%c0_20, %c0_21] : memref<8x32xf32, #tpu.memory_space<vmem>>, vector<8x32xf32>
      %c0_i32_22 = arith.constant 0 : i32
      %c8_i32 = arith.constant 8 : i32
      %33 = arith.muli %c0_i32_22, %c8_i32 : i32
      %34 = tpu.assume_multiple %33, 8 : i32
      %35 = arith.index_cast %34 : i32 to index
      %c0_23 = arith.constant 0 : index
      %36 = vector.load %arg1[%35, %c0_23] : memref<8x32xf32, #tpu.memory_space<vmem>>, vector<8x32xf32>
      %c0_24 = arith.constant 0 : index
      %c0_25 = arith.constant 0 : index
      %37 = vector.load %arg3[%c0_24, %c0_25] : memref<32x128xf32, #tpu.memory_space<vmem>>, vector<32x128xf32>
      %cst_26 = arith.constant dense<0.000000e+00> : vector<8x128xf32>
      %38 = tpu.matmul %36, %37, %cst_26 {dimension_numbers = #tpu.dot_dimension_numbers<[1], [0], [0], [1], [0, 0, 1, 1], [], []>} : vector<8x32xf32>, vector<32x128xf32>, vector<8x128xf32> -> vector<8x128xf32>
      %c0_27 = arith.constant 0 : index
      %c0_28 = arith.constant 0 : index
      %39 = vector.load %arg4[%c0_27, %c0_28] : memref<32x128xf32, #tpu.memory_space<vmem>>, vector<32x128xf32>
      %cst_29 = arith.constant dense<0.000000e+00> : vector<8x128xf32>
      %40 = tpu.matmul %32, %39, %cst_29 {dimension_numbers = #tpu.dot_dimension_numbers<[1], [0], [0], [1], [0, 0, 1, 1], [], []>} : vector<8x32xf32>, vector<32x128xf32>, vector<8x128xf32> -> vector<8x128xf32>
      %41 = arith.addf %38, %40 : vector<8x128xf32>
      %c0_30 = arith.constant 0 : index
      %c0_31 = arith.constant 0 : index
      %42 = vector.load %arg5[%c0_30, %c0_31] : memref<1x128xf32, #tpu.memory_space<vmem>>, vector<1x128xf32>
      %43 = vector.broadcast %42 : vector<1x128xf32> to vector<8x128xf32>
      %44 = arith.addf %41, %43 : vector<8x128xf32>
      %45 = vector.extract_strided_slice %44 {offsets = [0, 0], sizes = [8, 32], strides = [1, 1]} : vector<8x128xf32> to vector<8x32xf32>
      %46 = arith.negf %45 : vector<8x32xf32>
      %47 = math.exp %46 : vector<8x32xf32>
      %cst_32 = arith.constant 1.000000e+00 : f32
      %48 = vector.broadcast %cst_32 : f32 to vector<8x32xf32>
      %49 = arith.addf %48, %47 : vector<8x32xf32>
      %50 = arith.divf %48, %49 : vector<8x32xf32>
      %51 = vector.extract_strided_slice %44 {offsets = [0, 32], sizes = [8, 32], strides = [1, 1]} : vector<8x128xf32> to vector<8x32xf32>
      %52 = arith.negf %51 : vector<8x32xf32>
      %53 = math.exp %52 : vector<8x32xf32>
      %cst_33 = arith.constant 1.000000e+00 : f32
      %54 = vector.broadcast %cst_33 : f32 to vector<8x32xf32>
      %55 = arith.addf %54, %53 : vector<8x32xf32>
      %56 = arith.divf %54, %55 : vector<8x32xf32>
      %57 = vector.extract_strided_slice %44 {offsets = [0, 64], sizes = [8, 32], strides = [1, 1]} : vector<8x128xf32> to vector<8x32xf32>
      %58 = vector.extract_strided_slice %44 {offsets = [0, 96], sizes = [8, 32], strides = [1, 1]} : vector<8x128xf32> to vector<8x32xf32>
      %59 = arith.mulf %50, %58 : vector<8x32xf32>
      %60 = arith.addf %57, %59 : vector<8x32xf32>
      %61 = math.tanh %60 : vector<8x32xf32>
      %cst_34 = arith.constant 1.000000e+00 : f32
      %62 = vector.broadcast %cst_34 : f32 to vector<8x32xf32>
      %63 = arith.subf %62, %56 : vector<8x32xf32>
      %64 = arith.mulf %63, %61 : vector<8x32xf32>
      %65 = arith.mulf %56, %32 : vector<8x32xf32>
      %66 = arith.addf %64, %65 : vector<8x32xf32>
      %67 = arith.truncf %66 : vector<8x32xf32> to vector<8x32xbf16>
      %68 = arith.index_cast %34 : i32 to index
      %c0_35 = arith.constant 0 : index
      %69 = vector.load %arg11[%68, %c0_35] : memref<8x32xbf16, #tpu.memory_space<vmem>>, vector<8x32xbf16>
      tpu.vector_store %arg11[%68, %c0_35], %67 {strides = array<i32>} : memref<8x32xbf16, #tpu.memory_space<vmem>>, vector<8x32xbf16>,
      %c1_i32 = arith.constant 1 : i32
      %c0_36 = arith.constant 0 : index
      %c0_37 = arith.constant 0 : index
      %70 = vector.load %arg10[%c0_36, %c0_37] : memref<8x32xf32, #tpu.memory_space<vmem>>, vector<8x32xf32>
      tpu.vector_store %arg10[%c0_36, %c0_37], %66 {strides = array<i32>} : memref<8x32xf32, #tpu.memory_space<vmem>>, vector<8x32xf32>,
      %cst_38 = arith.constant -1.000000e+30 : f32
      %71 = vector.broadcast %cst_38 : f32 to vector<8x128xf32>
      %c0_39 = arith.constant 0 : index
      %c0_40 = arith.constant 0 : index
      %72 = vector.load %arg12[%c0_39, %c0_40] : memref<8x128xf32, #tpu.memory_space<vmem>>, vector<8x128xf32>
      tpu.vector_store %arg12[%c0_39, %c0_40], %71 {strides = array<i32>} : memref<8x128xf32, #tpu.memory_space<vmem>>, vector<8x128xf32>,
      %cst_41 = arith.constant 0.000000e+00 : f32
      %73 = vector.broadcast %cst_41 : f32 to vector<8x128xf32>
      %c0_42 = arith.constant 0 : index
      %c0_43 = arith.constant 0 : index
      %74 = vector.load %arg13[%c0_42, %c0_43] : memref<8x128xf32, #tpu.memory_space<vmem>>, vector<8x128xf32>
      tpu.vector_store %arg13[%c0_42, %c0_43], %73 {strides = array<i32>} : memref<8x128xf32, #tpu.memory_space<vmem>>, vector<8x128xf32>,
    } else {
    }
    %c0 = arith.constant 0 : index
    %c0_1 = arith.constant 0 : index
    %3 = vector.load %arg11[%c0, %c0_1] : memref<8x32xbf16, #tpu.memory_space<vmem>>, vector<8x32xbf16>
    %c0_2 = arith.constant 0 : index
    %c0_3 = arith.constant 0 : index
    %4 = vector.load %arg6[%c0_2, %c0_3] : memref<32x256xbf16, #tpu.memory_space<vmem>>, vector<32x256xbf16>
    %cst = arith.constant dense<0.000000e+00> : vector<8x256xf32>
    %5 = tpu.matmul %3, %4, %cst {dimension_numbers = #tpu.dot_dimension_numbers<[1], [0], [0], [1], [0, 0, 1, 1], [], []>} : vector<8x32xbf16>, vector<32x256xbf16>, vector<8x256xf32> -> vector<8x256xf32>
    %c0_4 = arith.constant 0 : index
    %c0_5 = arith.constant 0 : index
    %6 = vector.load %arg7[%c0_4, %c0_5] : memref<1x256xf32, #tpu.memory_space<vmem>>, vector<1x256xf32>
    %7 = vector.broadcast %6 : vector<1x256xf32> to vector<8x256xf32>
    %8 = arith.addf %5, %7 : vector<8x256xf32>
    %c0_6 = arith.constant 0 : index
    %c0_7 = arith.constant 0 : index
    %9 = vector.load %arg8[%c0_6, %c0_7] : memref<8x256xf32, #tpu.memory_space<vmem>>, vector<8x256xf32>
    tpu.vector_store %arg8[%c0_6, %c0_7], %8 {strides = array<i32>} : memref<8x256xf32, #tpu.memory_space<vmem>>, vector<8x256xf32>,
    %c0_8 = arith.constant 0 : index
    %c0_9 = arith.constant 0 : index
    %10 = vector.load %arg12[%c0_8, %c0_9] : memref<8x128xf32, #tpu.memory_space<vmem>>, vector<8x128xf32>
    %cst_10 = arith.constant dense<0xFF800000> : vector<8xf32>
    %11 = vector.multi_reduction <maximumf>, %8, %cst_10 [1] : vector<8x256xf32> to vector<8xf32>
    %12 = vector.shape_cast %11 : vector<8xf32> to vector<8x1xf32>
    %13 = vector.broadcast %12 : vector<8x1xf32> to vector<8x128xf32>
    %14 = arith.maximumf %10, %13 : vector<8x128xf32>
    %c0_11 = arith.constant 0 : index
    %c0_12 = arith.constant 0 : index
    %15 = vector.load %arg13[%c0_11, %c0_12] : memref<8x128xf32, #tpu.memory_space<vmem>>, vector<8x128xf32>
    %16 = arith.subf %10, %14 : vector<8x128xf32>
    %17 = math.exp %16 : vector<8x128xf32>
    %18 = arith.mulf %15, %17 : vector<8x128xf32>
    %19 = vector.extract_strided_slice %14 {offsets = [0, 0], sizes = [8, 1], strides = [1, 1]} : vector<8x128xf32> to vector<8x1xf32>
    %20 = vector.broadcast %19 : vector<8x1xf32> to vector<8x256xf32>
    %21 = arith.subf %8, %20 : vector<8x256xf32>
    %22 = math.exp %21 : vector<8x256xf32>
    %cst_13 = arith.constant dense<0.000000e+00> : vector<8xf32>
    %23 = vector.multi_reduction <add>, %22, %cst_13 [1] : vector<8x256xf32> to vector<8xf32>
    %24 = vector.shape_cast %23 : vector<8xf32> to vector<8x1xf32>
    %25 = vector.broadcast %24 : vector<8x1xf32> to vector<8x128xf32>
    %26 = arith.addf %18, %25 : vector<8x128xf32>
    %c0_14 = arith.constant 0 : index
    %c0_15 = arith.constant 0 : index
    %27 = vector.load %arg13[%c0_14, %c0_15] : memref<8x128xf32, #tpu.memory_space<vmem>>, vector<8x128xf32>
    tpu.vector_store %arg13[%c0_14, %c0_15], %26 {strides = array<i32>} : memref<8x128xf32, #tpu.memory_space<vmem>>, vector<8x128xf32>,
    %c0_16 = arith.constant 0 : index
    %c0_17 = arith.constant 0 : index
    %28 = vector.load %arg12[%c0_16, %c0_17] : memref<8x128xf32, #tpu.memory_space<vmem>>, vector<8x128xf32>
    tpu.vector_store %arg12[%c0_16, %c0_17], %14 {strides = array<i32>} : memref<8x128xf32, #tpu.memory_space<vmem>>, vector<8x128xf32>,
    %c0_i32_18 = arith.constant 0 : i32
    %29 = arith.cmpi eq, %arg0, %c0_i32_18 : i32
    %30 = arith.extui %29 : i1 to i32
    %c0_i32_19 = arith.constant 0 : i32
    %31 = arith.cmpi ne, %30, %c0_i32_19 : i32
    scf.if %31 {
      %c0_20 = arith.constant 0 : index
      %c0_21 = arith.constant 0 : index
      %32 = vector.load %arg12[%c0_20, %c0_21] : memref<8x128xf32, #tpu.memory_space<vmem>>, vector<8x128xf32>
      %c0_22 = arith.constant 0 : index
      %c0_23 = arith.constant 0 : index
      %33 = vector.load %arg13[%c0_22, %c0_23] : memref<8x128xf32, #tpu.memory_space<vmem>>, vector<8x128xf32>
      %34 = math.log %33 : vector<8x128xf32>
      %35 = arith.addf %32, %34 : vector<8x128xf32>
      %c0_24 = arith.constant 0 : index
      %c0_25 = arith.constant 0 : index
      %36 = vector.load %arg9[%c0_24, %c0_25] : memref<8x128xf32, #tpu.memory_space<vmem>>, vector<8x128xf32>
      tpu.vector_store %arg9[%c0_24, %c0_25], %35 {strides = array<i32>} : memref<8x128xf32, #tpu.memory_space<vmem>>, vector<8x128xf32>,
    } else {
    }
    return
  }
  func.func @transform_0(%arg0: i32) -> (i32, i32) {
    %c0_i32 = arith.constant 0 : i32
    %c0_i32_0 = arith.constant 0 : i32
    %c0_i32_1 = arith.constant 0 : i32
    return %c0_i32, %c0_i32_0 : i32, i32
  }
  func.func @transform_1(%arg0: i32) -> (i32, i32) {
    %c0_i32 = arith.constant 0 : i32
    %c0_i32_0 = arith.constant 0 : i32
    %c0_i32_1 = arith.constant 0 : i32
    return %c0_i32, %c0_i32_0 : i32, i32
  }
  func.func @transform_2(%arg0: i32) -> (i32, i32) {
    %c0_i32 = arith.constant 0 : i32
    %c0_i32_0 = arith.constant 0 : i32
    %c0_i32_1 = arith.constant 0 : i32
    return %c0_i32, %c0_i32_0 : i32, i32
  }
  func.func @transform_3(%arg0: i32) -> (i32, i32) {
    %c0_i32 = arith.constant 0 : i32
    %c0_i32_0 = arith.constant 0 : i32
    %c0_i32_1 = arith.constant 0 : i32
    return %c0_i32, %c0_i32_0 : i32, i32
  }
  func.func @transform_4(%arg0: i32) -> (i32, i32) {
    %c0_i32 = arith.constant 0 : i32
    %c0_i32_0 = arith.constant 0 : i32
    %c0_i32_1 = arith.constant 0 : i32
    return %c0_i32, %c0_i32_0 : i32, i32
  }
  func.func @transform_5(%arg0: i32) -> (i32, i32) {
    %c0_i32 = arith.constant 0 : i32
    %c0_i32_0 = arith.constant 0 : i32
    return %c0_i32, %arg0 : i32, i32
  }
  func.func @transform_6(%arg0: i32) -> (i32, i32) {
    %c0_i32 = arith.constant 0 : i32
    %c0_i32_0 = arith.constant 0 : i32
    return %c0_i32, %arg0 : i32, i32
  }
  func.func @transform_7(%arg0: i32) -> (i32, i32) {
    %c0_i32 = arith.constant 0 : i32
    %c0_i32_0 = arith.constant 0 : i32
    return %c0_i32, %arg0 : i32, i32
  }
  func.func @transform_8(%arg0: i32) -> (i32, i32) {
    %c0_i32 = arith.constant 0 : i32
    %c0_i32_0 = arith.constant 0 : i32
    %c0_i32_1 = arith.constant 0 : i32
    return %c0_i32, %c0_i32_0 : i32, i32
  }
  func.func @transform_9(%arg0: i32) -> (i32, i32) {
    %c0_i32 = arith.constant 0 : i32
    %c0_i32_0 = arith.constant 0 : i32
    %c0_i32_1 = arith.constant 0 : i32
    return %c0_i32, %c0_i32_0 : i32, i32
  }
}

</mosaic_0001>

<bundles_post_ra>
// kernel: tpu_custom_call.1
= control target key start
LH: loop header
LB: loop body
LE: loop exit
PB: predicated region body
PF: predicated region fallthrough
CT: control target
= control target key end

     0   :  { %15 = vsyncpa [#allocation6], 0  ;;  %s837_s0 = inlined_call_operand.hbm [shape: f32[8,32], index: 0, kind: input, shape index: {}]   ;;  %s838_s1 = inlined_call_operand.hbm [shape: f32[8,32], index: 1, kind: input, shape index: {}]   ;;  %s839_s2 = inlined_call_operand.hbm [shape: f32[32,128], index: 2, kind: input, shape index: {}]   ;;  %s840_s3 = inlined_call_operand.hbm [shape: f32[32,128], index: 3, kind: input, shape index: {}]   ;;  %s841_s4 = inlined_call_operand.vmem [shape: f32[1,128], index: 4, kind: input, shape index: {}]   ;;  %s842_s5 = inlined_call_operand.hbm [shape: bf16[32,256], index: 5, kind: input, shape index: {}]   ;;  %s843_s6 = inlined_call_operand.vmem [shape: f32[1,256], index: 6, kind: input, shape index: {}]   ;;  %s844_s7 = inlined_call_operand.hbm [shape: f32[8,256], index: 7, kind: output, shape index: {0}]   ;;  %s845_s8 = inlined_call_operand.hbm [shape: f32[8,128], index: 8, kind: output, shape index: {1}]   ;;  %s846_s9 = inlined_call_operand.hbm [shape: f32[8,32], index: 9, kind: output, shape index: {2}]  }
   0x1   :  { %16 = vsyncpa [#allocation9], 0 }
   0x2   :  { %17 = vsyncpa [#allocation12], 0 }
   0x3   :  { %18 = vsyncpa [#allocation7], 0 }
   0x4   :  { %19 = vsyncpa [#allocation16], 0  ;;  %s723_s30 = smov [#allocation8]  }
   0x5   :  { %s36_s10 = sshll.u32 %s723_s30, 4  ;;  %s37_s10 = int_to_ptr.vmem [resolvable:$true] %s36_s10 }
   0x6   :  { %s561_s11 = scalar_lea.vmem %s37_s10, 128  ;;  %p566_p1 = scmp.lt.s32.totalorder %s37_s10, %s37_s10 }
   0x7   :  { %p562_p0 = scmp.ne.s32.totalorder %s37_s10, %s561_s11  ;;  %p567_p2 = scmp.lt.s32.totalorder %s561_s11, %s561_s11 }
   0x9   :  { %p568_p3 = por %p567_p2, %p566_p1 }
   0xb   :  { %p569_p4 = pnand %p568_p3, %p562_p0 }
   0xd   :  { %572 = shalt.err (!%p569_p4)
}
   0xe   :  { %39 = dma.hbm_to_vmem [thread:$0]  %s838_s1, 128, %s37_s10, [#allocation9]  }
   0xf   :  { %s724_s14 = smov [#allocation11]   ;;  %s725_s16 = smov [#allocation5]  }
  0x10   :  { %s57_s15 = sshll.u32 %s724_s14, 4  ;;  %s26_s17 = sshll.u32 %s725_s16, 4  ;;  %s58_s15 = int_to_ptr.vmem [resolvable:$true] %s57_s15  ;;  %s27_s17 = int_to_ptr.vmem [resolvable:$true] %s26_s17 }
  0x11   :  { %s581_s18 = scalar_lea.vmem %s58_s15, 512  ;;  %p586_p6 = scmp.lt.s32.totalorder %s58_s15, %s58_s15 }
  0x12   :  { %p582_p5 = scmp.ne.s32.totalorder %s58_s15, %s581_s18  ;;  %p587_p7 = scmp.lt.s32.totalorder %s581_s18, %s581_s18 }
  0x14   :  { %p588_p8 = por %p587_p7, %p586_p6 }
  0x16   :  { %p589_p9 = pnand %p588_p8, %p582_p5 }
  0x18   :  { %592 = shalt.err (!%p589_p9)
}
  0x19   :  { %s726_s19 = smov 128   ;;  %s727_s20 = smov 8  }
  0x1a   :  { %63 = dma.hbm_to_vmem [thread:$0]  %s840_s3, 512, %s58_s15, [#allocation12], %s726_s19, %s726_s19, %s727_s20  }
  0x1b   :  { %s601_s1 = scalar_lea.vmem %s27_s17, 128  ;;  %p606_p11 = scmp.lt.s32.totalorder %s27_s17, %s27_s17 }
  0x1c   :  { %p602_p10 = scmp.ne.s32.totalorder %s27_s17, %s601_s1  ;;  %p607_p12 = scmp.lt.s32.totalorder %s601_s1, %s601_s1 }
  0x1e   :  { %p608_p13 = por %p607_p12, %p606_p11 }
  0x20   :  { %p609_p0 = pnand %p608_p13, %p602_p10 }
  0x22   :  { %612 = shalt.err (!%p609_p0)
}
  0x23   :  { %29 = dma.hbm_to_vmem [thread:$0]  %s837_s0, 128, %s27_s17, [#allocation6]  }
  0x24   :  { %s728_s25 = smov [#allocation10]   ;;  %s729_s27 = smov [#allocation13]  }
  0x25   :  { %s45_s26 = sshll.u32 %s728_s25, 4  ;;  %s71_s28 = sshll.u32 %s729_s27, 4  ;;  %s46_s26 = int_to_ptr.vmem [resolvable:$true] %s45_s26  ;;  %s72_s28 = int_to_ptr.vmem [resolvable:$true] %s71_s28 }
  0x26   :  { %s621_s29 = scalar_lea.vmem %s46_s26, 512  ;;  %p626_p2 = scmp.lt.s32.totalorder %s46_s26, %s46_s26 }
  0x27   :  { %p622_p1 = scmp.ne.s32.totalorder %s46_s26, %s621_s29  ;;  %p627_p3 = scmp.lt.s32.totalorder %s621_s29, %s621_s29 }
  0x29   :  { %p628_p4 = por %p627_p3, %p626_p2 }
  0x2b   :  { %p629_p5 = pnand %p628_p4, %p622_p1 }
  0x2d   :  { %632 = shalt.err (!%p629_p5)
}
  0x2e   :  { %51 = dma.hbm_to_vmem [thread:$0]  %s839_s2, 512, %s46_s26, [#allocation9], %s726_s19, %s726_s19, %s727_s20  }
  0x2f   :  { %s641_s0 = scalar_lea.vmem %s72_s28, 512  ;;  %p646_p7 = scmp.lt.s32.totalorder %s72_s28, %s72_s28 }
  0x30   :  { %p642_p6 = scmp.ne.s32.totalorder %s72_s28, %s641_s0  ;;  %p647_p8 = scmp.lt.s32.totalorder %s641_s0, %s641_s0 }
  0x32   :  { %p648_p9 = por %p647_p8, %p646_p7 }
  0x34   :  { %p649_p10 = pnand %p648_p9, %p642_p6 }
  0x36   :  { %652 = shalt.err (!%p649_p10)
}
  0x37   :  { %77 = dma.hbm_to_vmem [thread:$0]  %s842_s5, 512, %s72_s28, [#allocation12], %s726_s19, %s726_s19, %s727_s20  }
  0x38   :  { %713 = dma.done.wait [#allocation6], 128  }
  0x39   :  { %714 = vsyncadd [#allocation6], 4294967168 }
  0x3a   :  { %715 = dma.done.wait [#allocation9], 640  }
  0x3b   :  { %716 = vsyncadd [#allocation9], 4294966656 }
  0x3c   :  { %717 = dma.done.wait [#allocation12], 1024  }
  0x3d   :  { %718 = vsyncadd [#allocation12], 4294966272  ;;  %v730_v0 = vmov 0.0   ;;  %vm731_vm0 = vmmov 0   ;;  %v109_v1 = vld [vmem:[#allocation11 + $0x18] sm:$0xff]  ;;  %v108_v2 = vld [vmem:[#allocation11 + $0x10] sm:$0xff]  ;;  %v316_v41 = vlaneseq }
  0x3e   :  { %494 = vmatprep.subr.mxu1 %v730_v0  ;;  %502 = vmatprep.mubr.msk.f32.mxu1 %vm731_vm0, %v730_v0  ;;  %v107_v3 = vld [vmem:[#allocation11 + $0x8] sm:$0xff]  ;;  %v106_v4 = vld [vmem:[#allocation11] sm:$0xff]  ;;  %v100_v5 = vld [vmem:[#allocation8] sm:$0xff]  ;;  %vm110_vm1 = vcmask 261120   ;;  %s732_s12 = smov 32   ;;  %s733_s13 = smov 64  }
  0x3f   :  { %495 = vmatpush3.msra.mxu1 %v109_v1  ;;  %v105_v6 = vld [vmem:[#allocation10 + $0x18] sm:$0xff]  ;;  %v104_v7 = vld [vmem:[#allocation10 + $0x10] sm:$0xff]  ;;  %v103_v8 = vld [vmem:[#allocation10 + $0x8] sm:$0xff]  ;;  %v735_v31 = vmov 0   ;;  %vm300_vm2 = vcmask 257024   ;;  %v317_v42 = vshrl.u32 %v316_v41, 7 }
  0x40   :  { %496 = vmatprep.subr.mxu1 %v730_v0  ;;  %v102_v9 = vld [vmem:[#allocation10] sm:$0xff]  ;;  %v101_v10 = vld [vmem:[#allocation5] sm:$0xff]  ;;  %v475_v14 = vld [vmem:[%s841_s4] ss:$0 sm:$0xff]  ;;  %s734_s4 = smov 96   ;;  %382 = vmatprep.mubr.bf16.mxu0 %v735_v31 }
  0x41   :  { %497 = vmatpush3.msra.mxu1 %v108_v2  ;;  %v533_v27 = vld [vmem:[#allocation13 + $0x14] ss:$8 sps:$4 sm:$0xff]   ;;  %v535_v28 = vld [vmem:[#allocation13 + $0x10] ss:$8 sps:$4 sm:$0xff]   ;;  %v536_v29 = vld [vmem:[#allocation13 + $0x4] ss:$8 sps:$4 sm:$0xff]   ;;  %532 = vset.pattern.permute.xlu0 %v735_v31 }
  0x42   :  { %498 = vmatprep.subr.mxu1 %v730_v0  ;;  %362 = vmatprep.subr.bf16.mxu0 %v533_v27  ;;  %v538_v30 = vld [vmem:[#allocation13] ss:$8 sps:$4 sm:$0xff]   ;;  %v318_v43 = vsub.s32 0, %v317_v42  ;;  %v314_v44 = vld [vmem:[%s843_s6] sm:$0x3]  ;;  %v322_v45 = vsub.s32 1, %v317_v42 }
  0x43   :  { %499 = vmatpush3.msra.mxu1 %v107_v3  ;;  %363 = vmatpush1.bf16.msra.mxu0 %v535_v28  ;;  %s736_s6 = smov [#allocation14]  }
  0x44   :  { %500 = vmatprep.subr.mxu1 %v730_v0  ;;  %364 = vmatprep.subr.bf16.mxu0 %v536_v29  ;;  %v319_v46 = vrot.slane %v314_v44, %v318_v43  ;;  %v323_v47 = vrot.slane %v314_v44, %v322_v45  ;;  %s435_s16 = sshll.u32 %s736_s6, 4  ;;  %s436_s16 = int_to_ptr.vmem [resolvable:$true] %s435_s16 }
  0x45   :  { %501 = vmatpush3.msra.mxu1 %v106_v4  ;;  %s653_s17 = scalar_lea.vmem %s436_s16, 256  ;;  %p658_p12 = scmp.lt.s32.totalorder %s436_s16, %s436_s16 }
  0x46   :  { %503 = vmatmul.mubr.msk.f32.vlgmr.msra.gmra.mxu1 %vm110_vm1, %v100_v5  ;;  %505 = vmatprep.subr.mxu1 %v730_v0  ;;  %p654_p11 = scmp.ne.s32.totalorder %s436_s16, %s653_s17  ;;  %p659_p13 = scmp.lt.s32.totalorder %s653_s17, %s653_s17 }
  0x47   :  { %506 = vmatpush3.msra.mxu1 %v105_v6  ;;  %513 = vmatprep.mubr.msk.f32.mxu1 %vm731_vm0, %v730_v0 }
  0x48   :  { %507 = vmatprep.subr.mxu1 %v730_v0  ;;  %365 = vmatpush1.bf16.msra.mxu0 %v538_v30  ;;  %p660_p0 = por %p659_p13, %p658_p12 }
  0x49   :  { %508 = vmatpush3.msra.mxu1 %v104_v7 }
  0x4a   :  { %509 = vmatprep.subr.mxu1 %v730_v0  ;;  %p661_p1 = pnand %p660_p0, %p654_p11 }
  0x4b   :  { %510 = vmatpush3.msra.mxu1 %v103_v8 }
  0x4c   :  { %511 = vmatprep.subr.mxu1 %v730_v0 }
  0x4d   :  { %512 = vmatpush3.msra.mxu1 %v102_v9 }
  0x4e   :  { %514 = vmatmul.mubr.msk.f32.vlgmr.msra.gmra.mxu1 %vm110_vm1, %v101_v10 }
 0x106   :  { %v180_v11 = vpop.f32.mrf.mxu1 }
 0x108   :  { %v504_v12 = vpop.f32.mrf.mxu1 }
 0x10e   :  { %v253_v13 = vpop.f32.mrf.mxu1 }
 0x10f   :  { %v254_v15 = vadd.f32 %v253_v13, %v180_v11 }
 0x110   :  { %v515_v16 = vpop.f32.mrf.mxu1 }
 0x111   :  { %v264_v17 = vadd.f32 %v475_v14, %v254_v15 }
 0x113   :  { %272 = vrot.lane.b32.xlu0 %v264_v17, %s732_s12  ;;  %v476_v18 = vmul.f32 -1.442695, %v264_v17 }
 0x115   :  { %539 = vpow2.f32 %v476_v18 }
 0x122   :  { %v540_v19 = vpop.eup %539 }
 0x123   :  { %v268_v20 = vadd.f32 1.0, %v540_v19 }
 0x125   :  { %541 = vrcp.f32 %v268_v20 }
 0x132   :  { %v542_v21 = vpop.eup %541 }
 0x133   :  { %v282_v33 = vsub.f32 1.0, %v542_v21 }
 0x185   :  { %v273_v22 = vpop.permute.xlu0 %272 }
 0x186   :  { %v275_v23 = vmul.f32 %v542_v21, %v273_v22 }
 0x188   :  { %277 = vrot.lane.b32.xlu0 %v275_v23, %s733_s13 }
 0x1fa   :  { %v278_v24 = vpop.permute.xlu0 %277 }
 0x1fb   :  { %v280_v25 = vadd.f32 %v278_v24, %v264_v17 }
 0x1fd   :  { %543 = vtanh.f32 %v280_v25 }
 0x20a   :  { %v544_v26 = vpop.eup %543 }
 0x20b   :  { %284 = vrot.lane.b32.xlu1 %v544_v26, %s734_s4 }
 0x20f   :  { %288 = vrot.lane.b32.xlu1 %v100_v5, %s732_s12 }
 0x27d   :  { %v285_v32 = vpop.permute.xlu1 %284 }
 0x27e   :  { %v287_v35 = vmul.f32 %v285_v32, %v282_v33 }
 0x281   :  { %v289_v34 = vpop.permute.xlu1 %288 }
 0x282   :  { %v291_v36 = vmul.f32 %v542_v21, %v289_v34 }
 0x284   :  { %v292_v37 = vadd.f32 %v291_v36, %v287_v35 }
 0x286   :  { %v483_v38 = vpack.c.bf16 %v292_v37, %v292_v37 }
 0x288   :  { %297 = vrot.lane.b32.xlu0 %v483_v38, %s734_s4 }
 0x2fa   :  { %v298_v39 = vpop.permute.xlu0 %297 }
 0x2fb   :  { %301 = vst.msk [vmem:[#allocation2] sm:$0xf] %vm300_vm2, %v298_v39 }
 0x302   :  { %v309_v40 = vld [vmem:[#allocation2] sm:$0xf] }
 0x303   :  { %482 = vmatmul.mubr.msk.bf16.vlgmr.msra.gmra.mxu0 %vm110_vm1, %v309_v40 }
 0x3c3   :  { %v384_v48 = vpop.f32.mrf.mxu0 }
 0x3c4   :  { %v385_v49 = vadd.f32 %v384_v48, %v319_v46 }
 0x3c5   :  { %v386_v50 = vpop.f32.mrf.mxu0 }
 0x3c6   :  { %391 = vst [vmem:[#allocation14] sm:$0xff] %v385_v49  ;;  %v387_v51 = vadd.f32 %v386_v50, %v323_v47 }
 0x3c7   :  { %v388_v52 = vpop.f32.mrf.mxu0 }
 0x3c8   :  { %392 = vst [vmem:[#allocation14 + $0x8] sm:$0xff] %v387_v51  ;;  %v394_v53 = vmax.f32 %v385_v49, %v387_v51 }
 0x3c9   :  { %v389_v54 = vpop.f32.mrf.mxu0 }
 0x3ca   :  { %395 = vmax.xlane.f32.xlu1 %v394_v53 }
 0x3db   :  { %303 = vrot.lane.b32.xlu1 %v292_v37, %s734_s4 }
 0x453   :  { %v396_v55 = vpop.xlane.xlu1 %395 }
 0x454   :  { %v397_v56 = vmax.f32 %v396_v55, -1e+30 }
 0x456   :  { %405 = vperm.xlu0 %532, %v397_v56  }
 0x457   :  { %v304_v57 = vpop.permute.xlu1 %303 }
 0x458   :  { %306 = vst.msk [vmem:[#allocation17] sm:$0xff] %vm110_vm1, %v304_v57 }
 0x4d1   :  { %v406_v58 = vpop.permute.xlu0 %405 }
 0x4d2   :  { %v408_v59 = vsub.f32 %v385_v49, %v406_v58  ;;  %v409_v60 = vsub.f32 %v387_v51, %v406_v58 }
 0x4d4   :  { %v410_v61 = vmul.f32 1.442695, %v408_v59  ;;  %v412_v62 = vmul.f32 1.442695, %v409_v60 }
 0x4d6   :  { %545 = vpow2.f32 %v410_v61 }
 0x4d7   :  { %547 = vpow2.f32 %v412_v62 }
 0x4e3   :  { %v546_v63 = vpop.eup %545 }
 0x4e4   :  { %v548_v0 = vpop.eup %547 }
 0x4e5   :  { %v414_v1 = vadd.f32 %v548_v0, %v546_v63 }
 0x4e7   :  { %415 = vadd.xlane.f32.xlu0 %v414_v1 }
 0x4e8   :  { %664 = shalt.err (!%p661_p1)
}
 0x4e9   :  { %438 = dma.vmem_to_hbm [thread:$0]  %s436_s16, 256, %s844_s7, [#allocation7]   ;;  %v399_v2 = vsub.f32 -1e+30, %v397_v56 }
 0x4ea   :  { %s737_s20 = smov [#allocation15]   ;;  %s738_s22 = smov [#allocation17]  }
 0x4eb   :  { %v400_v3 = vmul.f32 1.442695, %v399_v2  ;;  %s445_s21 = sshll.u32 %s737_s20, 4  ;;  %s455_s1 = sshll.u32 %s738_s22, 4  ;;  %s446_s21 = int_to_ptr.vmem [resolvable:$true] %s445_s21  ;;  %s456_s1 = int_to_ptr.vmem [resolvable:$true] %s455_s1 }
 0x4ec   :  { %s673_s23 = scalar_lea.vmem %s446_s21, 128  ;;  %p678_p3 = scmp.lt.s32.totalorder %s446_s21, %s446_s21 }
 0x4ed   :  { %549 = vpow2.f32 %v400_v3  ;;  %p674_p2 = scmp.ne.s32.totalorder %s446_s21, %s673_s23  ;;  %p679_p4 = scmp.lt.s32.totalorder %s673_s23, %s673_s23 }
 0x4ef   :  { %p680_p5 = por %p679_p4, %p678_p3 }
 0x4f1   :  { %p681_p6 = pnand %p680_p5, %p674_p2 }
 0x4fa   :  { %v550_v4 = vpop.eup %549 }
 0x4fb   :  { %v402_v5 = vmul.f32 0.0, %v550_v4 }
 0x570   :  { %v416_v6 = vpop.xlane.xlu0 %415 }
 0x571   :  { %v417_v7 = vadd.f32 %v416_v6, %v402_v5 }
 0x573   :  { %551 = vlog2.f32 %v417_v7 }
 0x580   :  { %v552_v8 = vpop.eup %551 }
 0x581   :  { %v426_v9 = vmul.f32 0.6931472, %v552_v8 }
 0x583   :  { %v427_v10 = vadd.f32 %v426_v9, %v397_v56 }
 0x585   :  { %428 = vst [vmem:[#allocation15] sm:$0xff] %v427_v10 }
 0x586   :  { %684 = shalt.err (!%p681_p6)
}
 0x587   :  { %448 = dma.vmem_to_hbm [thread:$0]  %s446_s21, 128, %s845_s8, [#allocation16]  }
 0x588   :  { %s693_s25 = scalar_lea.vmem %s456_s1, 128  ;;  %p698_p8 = scmp.lt.s32.totalorder %s456_s1, %s456_s1 }
 0x589   :  { %p694_p7 = scmp.ne.s32.totalorder %s456_s1, %s693_s25  ;;  %p699_p9 = scmp.lt.s32.totalorder %s693_s25, %s693_s25 }
 0x58b   :  { %p700_p10 = por %p699_p9, %p698_p8 }
 0x58d   :  { %p701_p11 = pnand %p700_p10, %p694_p7 }
 0x58f   :  { %704 = shalt.err (!%p701_p11)
}
 0x590   :  { %458 = dma.vmem_to_hbm [thread:$0]  %s456_s1, 128, %s846_s9, [#allocation16]  }
 0x591   :  { %719 = dma.done.wait [#allocation7], 256  }
 0x592   :  { %720 = vsyncadd [#allocation7], 4294967040 }
 0x593   :  { %721 = dma.done.wait [#allocation16], 256  }
 0x594   :  { %722 = vsyncadd [#allocation16], 4294967040 }
 0x595   :  { %468 = vsyncpa [#allocation6], 1 }
 0x596   :  { %469 = vsyncpa [#allocation9], 1 }
 0x597   :  { %470 = vsyncpa [#allocation12], 1 }
 0x598   :  { %471 = vsyncpa [#allocation7], 1 }
 0x599   :  { %472 = vsyncpa [#allocation16], 1 }

</bundles_post_ra>
